<compile_context>
chip_gen: v7x
topology: tpu7x:2x2x1
jax: 0.10.0
libtpu: 0.0.40
codegen_flags: <defaults>
</compile_context>

<pallas_src>
import functools

import jax
import jax.numpy as jnp
from jax.experimental import pallas as pl
from jax.experimental.pallas import tpu as pltpu

LANE = 128      # vreg lane width — last-dim alignment
SUBLANE = 8     # vreg sublane count — second-to-last-dim alignment


def _round_up(x, m):
    return (x + m - 1) // m * m


def _vmem_budget_bytes():
    """~75% of physical VMEM (v5e/v6e: 128 MiB, v7x: 64 MiB per TC)."""
    try:
        cap = pltpu.get_tpu_info().vmem_capacity_bytes
    except Exception:
        cap = 64 * 1024 * 1024
    return int(cap) * 3 // 4


def _fused_mlp_kernel(*refs, num_layers):
    """Fused MLP over one batch tile.

    refs = (x_ref, w_0..w_{L-1}, b_0..b_{L-1}, o_ref)
      x_ref: [TM, K0p] f32   (padded, flattened input tile)
      w_l:   [Kp_l, Np_l] bf16 (lane-padded per-layer weight, VMEM-resident)
      b_l:   [1, Np_l]  f32    (lane-padded bias)
      o_ref: [TM, Np_{L-1}] f32 (padded output tile)
    The running activation `h` lives in vregs / compiler-managed VMEM —
    no explicit scratch, no per-layer store+reload.
    """
    x_ref = refs[0]
    w_refs = refs[1:1 + num_layers]
    b_refs = refs[1 + num_layers:1 + 2 * num_layers]
    o_ref = refs[1 + 2 * num_layers]

    h = x_ref[...].astype(jnp.bfloat16)            # cast once; bf16 MXU operand
    for layer in range(num_layers):                # static unroll (L is small)
        y = jnp.dot(h, w_refs[layer][...],
                    preferred_element_type=jnp.float32)   # f32 accumulate
        y = y + b_refs[layer][...]                 # bias add in f32
        if layer < num_layers - 1:
            h = jnp.maximum(y, 0.0).astype(jnp.bfloat16)  # ReLU f32, one cast
        else:
            o_ref[...] = y.astype(o_ref.dtype)


def init_mlp_params(key, input_dim, output_dim, dim, num_blocks,
                    dtype=jnp.float32):
    """Deterministic synthetic parameters matching MLP.__init__ shapes.

    Layer dims: input_dim->dim, (num_blocks-2) x (dim->dim), dim->output_dim.
    Weights stored as [in, out] (transposed vs. torch nn.Linear [out, in]).
    """
    dims = [input_dim] + [dim] * (num_blocks - 1) + [output_dim]
    params = []
    for i in range(len(dims) - 1):
        key, kw, kb = jax.random.split(key, 3)
        bound = 1.0 / jnp.sqrt(dims[i])
        w = jax.random.uniform(kw, (dims[i], dims[i + 1]),
                               minval=-bound, maxval=bound, dtype=dtype)
        b = jax.random.uniform(kb, (dims[i + 1],),
                               minval=-bound, maxval=bound, dtype=dtype)
        params.append((w, b))
    return params


def pack_mlp_params(params):
    """One-time packing: per-layer lane-padded bf16 weights + f32 biases.

    Do this once at parameter-load time and reuse the device arrays — it must
    NOT run on every forward call.
    """
    packed_w, packed_b = [], []
    for (w, b) in params:
        k_in, n_out = w.shape
        kp = _round_up(k_in, LANE)
        np_ = _round_up(n_out, LANE)
        wp = jnp.zeros((kp, np_), jnp.bfloat16).at[:k_in, :n_out].set(
            w.astype(jnp.bfloat16))
        bp = jnp.zeros((1, np_), jnp.float32).at[0, :n_out].set(
            b.astype(jnp.float32))
        packed_w.append(wp)
        packed_b.append(bp)
    out_dim = params[-1][0].shape[1]
    return tuple(packed_w), tuple(packed_b), out_dim


def mlp_forward(x, packed_w, packed_b, out_dim, *, tm_max=512):
    """Flatten, pad batch/features, run the fused multi-layer kernel once,
    slice back to the logical [B, out_dim] output."""
    B = x.shape[0]
    h = x.reshape(B, -1).astype(jnp.float32)       # x.view(x.size(0), -1)
    K0 = h.shape[1]
    num_layers = len(packed_w)
    k0_pad = packed_w[0].shape[0]
    out_pad = packed_w[-1].shape[1]
    assert K0 <= k0_pad, "packed params do not match input width"
    max_pad = max(max(w.shape[0], w.shape[1]) for w in packed_w)

    # Resident (single-buffered) weight/bias footprint.
    weight_bytes = (sum(int(w.size) * 2 for w in packed_w)
                    + sum(int(b.size) * 4 for b in packed_b))
    vmem_budget = _vmem_budget_bytes()

    # Batch tiling: biggest sublane-aligned tile (<= tm_max) that keeps
    # weights + double-buffered in/out tiles + temporaries inside the budget.
    b_pad = _round_up(B, SUBLANE)
    tile_m = min(tm_max, b_pad)
    while tile_m > SUBLANE:
        act_bytes = (2 * tile_m * (k0_pad + out_pad) * 4   # in/out, 2 buffers
                     + 4 * tile_m * max_pad * 4)           # layer temporaries
        if weight_bytes + act_bytes <= vmem_budget:
            break
        tile_m //= 2
    tile_m = max(min(tile_m, b_pad), SUBLANE)
    b_pad = _round_up(b_pad, tile_m)

    act_bytes = 2 * tile_m * (k0_pad + out_pad) * 4 + 4 * tile_m * max_pad * 4
    needed = weight_bytes + act_bytes + (2 << 20)
    vmem_limit = int(min(max(2 * needed, 32 << 20), vmem_budget))
    vmem_limit = max(vmem_limit, needed)

    x_pad = jnp.zeros((b_pad, k0_pad), jnp.float32).at[:B, :K0].set(h)

    grid = (b_pad // tile_m,)
    kernel = functools.partial(_fused_mlp_kernel, num_layers=num_layers)

    cost = pl.CostEstimate(
        flops=2 * b_pad * sum(int(w.shape[0]) * int(w.shape[1])
                              for w in packed_w),
        transcendentals=0,
        bytes_accessed=int(x_pad.size) * 4 + weight_bytes + b_pad * out_pad * 4,
    )

    # Activations / output: tiled over batch (auto-pipelined, double-buffered).
    # Weights / biases: whole-array VMEM residency, copied in once, never
    # double-buffered (grid-invariant).
    resident = pl.BlockSpec(memory_space=pltpu.MemorySpace.VMEM)
    in_specs = ([pl.BlockSpec((tile_m, k0_pad), lambda i: (i, 0))]
                + [resident] * (2 * num_layers))

    out_padded = pl.pallas_call(
        kernel,
        out_shape=jax.ShapeDtypeStruct((b_pad, out_pad), jnp.float32),
        grid_spec=pltpu.PrefetchScalarGridSpec(
            num_scalar_prefetch=0,
            grid=grid,
            in_specs=in_specs,
            out_specs=pl.BlockSpec((tile_m, out_pad), lambda i: (i, 0)),
        ),
        compiler_params=pltpu.CompilerParams(
            dimension_semantics=("parallel",),   # batch axis shards over TCs
            vmem_limit_bytes=vmem_limit,
        ),
        cost_estimate=cost,
    )(x_pad, *packed_w, *packed_b)

    return out_padded[:B, :out_dim]


if __name__ == "__main__":
    # Small shapes consistent with the module's forward:
    # x: [B, C, H, W] = [2, 4, 4, 4] -> flattened input_dim = 64
    B, C, H, W = 2, 4, 4, 4
    input_dim = C * H * W
    dim = 32
    output_dim = 8
    num_blocks = 3

    key = jax.random.PRNGKey(0)
    kx, kp = jax.random.split(key)
    x = jax.random.normal(kx, (B, C, H, W), dtype=jnp.float32)
    params = init_mlp_params(kp, input_dim, output_dim, dim, num_blocks)

    # One-time packing (hoisted out of the forward path).
    packed_w, packed_b, out_dim = pack_mlp_params(params)

    fwd = jax.jit(lambda xx: mlp_forward(xx, packed_w, packed_b, out_dim))
    out = jax.block_until_ready(fwd(x))

    # Pure-JAX f32 reference of the same semantics (kernel uses bf16 MXU
    # operands with f32 accumulation, so tolerance is loosened vs. pure f32).
    ref = x.reshape(B, -1)
    for i, (w, b) in enumerate(params):
        ref = ref @ w + b
        if i != len(params) - 1:
            ref = jnp.maximum(ref, 0.0)

    assert out.shape == (B, output_dim)
    assert jnp.allclose(out, ref, atol=2e-2, rtol=2e-2), (
        f"max abs err {jnp.max(jnp.abs(out - ref))}")

    print("KERNEL_OK")
</pallas_src>

<mosaic_0001>
module attributes {stable_mosaic.version = 11 : i64} {
  func.func @_fused_mlp_kernel(%arg0: i32, %arg1: memref<8x128xf32, #tpu.memory_space<vmem>>, %arg2: memref<128x128xbf16, #tpu.memory_space<vmem>>, %arg3: memref<128x128xbf16, #tpu.memory_space<vmem>>, %arg4: memref<128x128xbf16, #tpu.memory_space<vmem>>, %arg5: memref<1x128xf32, #tpu.memory_space<vmem>>, %arg6: memref<1x128xf32, #tpu.memory_space<vmem>>, %arg7: memref<1x128xf32, #tpu.memory_space<vmem>>, %arg8: memref<8x128xf32, #tpu.memory_space<vmem>>) attributes {dimension_semantics = [#tpu.dimension_semantics<parallel>], iteration_bounds = array<i64: 1>, scalar_prefetch = 0 : i64, scratch_operands = 0 : i64, tpu.core_type = #tpu.core_type<tc>, window_params = [{transform_indices = @transform_0, window_bounds = array<i64: 8, 128>}, {pipeline_mode = #tpu.pipeline_mode<synchronous>, transform_indices = @transform_1, window_bounds = array<i64: 128, 128>}, {pipeline_mode = #tpu.pipeline_mode<synchronous>, transform_indices = @transform_2, window_bounds = array<i64: 128, 128>}, {pipeline_mode = #tpu.pipeline_mode<synchronous>, transform_indices = @transform_3, window_bounds = array<i64: 128, 128>}, {pipeline_mode = #tpu.pipeline_mode<synchronous>, transform_indices = @transform_4, window_bounds = array<i64: 1, 128>}, {pipeline_mode = #tpu.pipeline_mode<synchronous>, transform_indices = @transform_5, window_bounds = array<i64: 1, 128>}, {pipeline_mode = #tpu.pipeline_mode<synchronous>, transform_indices = @transform_6, window_bounds = array<i64: 1, 128>}, {transform_indices = @transform_7, window_bounds = array<i64: 8, 128>}]} {
    %c0 = arith.constant 0 : index
    %c0_0 = arith.constant 0 : index
    %0 = vector.load %arg1[%c0, %c0_0] : memref<8x128xf32, #tpu.memory_space<vmem>>, vector<8x128xf32>
    %1 = arith.truncf %0 : vector<8x128xf32> to vector<8x128xbf16>
    %c0_1 = arith.constant 0 : index
    %c0_2 = arith.constant 0 : index
    %2 = vector.load %arg2[%c0_1, %c0_2] : memref<128x128xbf16, #tpu.memory_space<vmem>>, vector<128x128xbf16>
    %cst = arith.constant dense<0.000000e+00> : vector<8x128xf32>
    %3 = tpu.matmul %1, %2, %cst {dimension_numbers = #tpu.dot_dimension_numbers<[1], [0], [0], [1], [0, 0, 1, 1], [], []>} : vector<8x128xbf16>, vector<128x128xbf16>, vector<8x128xf32> -> vector<8x128xf32>
    %c0_3 = arith.constant 0 : index
    %c0_4 = arith.constant 0 : index
    %4 = vector.load %arg5[%c0_3, %c0_4] : memref<1x128xf32, #tpu.memory_space<vmem>>, vector<1x128xf32>
    %5 = vector.broadcast %4 : vector<1x128xf32> to vector<8x128xf32>
    %6 = arith.addf %3, %5 : vector<8x128xf32>
    %cst_5 = arith.constant 0.000000e+00 : f32
    %7 = vector.broadcast %cst_5 : f32 to vector<8x128xf32>
    %8 = arith.maximumf %6, %7 : vector<8x128xf32>
    %9 = arith.truncf %8 : vector<8x128xf32> to vector<8x128xbf16>
    %c0_6 = arith.constant 0 : index
    %c0_7 = arith.constant 0 : index
    %10 = vector.load %arg3[%c0_6, %c0_7] : memref<128x128xbf16, #tpu.memory_space<vmem>>, vector<128x128xbf16>
    %cst_8 = arith.constant dense<0.000000e+00> : vector<8x128xf32>
    %11 = tpu.matmul %9, %10, %cst_8 {dimension_numbers = #tpu.dot_dimension_numbers<[1], [0], [0], [1], [0, 0, 1, 1], [], []>} : vector<8x128xbf16>, vector<128x128xbf16>, vector<8x128xf32> -> vector<8x128xf32>
    %c0_9 = arith.constant 0 : index
    %c0_10 = arith.constant 0 : index
    %12 = vector.load %arg6[%c0_9, %c0_10] : memref<1x128xf32, #tpu.memory_space<vmem>>, vector<1x128xf32>
    %13 = vector.broadcast %12 : vector<1x128xf32> to vector<8x128xf32>
    %14 = arith.addf %11, %13 : vector<8x128xf32>
    %cst_11 = arith.constant 0.000000e+00 : f32
    %15 = vector.broadcast %cst_11 : f32 to vector<8x128xf32>
    %16 = arith.maximumf %14, %15 : vector<8x128xf32>
    %17 = arith.truncf %16 : vector<8x128xf32> to vector<8x128xbf16>
    %c0_12 = arith.constant 0 : index
    %c0_13 = arith.constant 0 : index
    %18 = vector.load %arg4[%c0_12, %c0_13] : memref<128x128xbf16, #tpu.memory_space<vmem>>, vector<128x128xbf16>
    %cst_14 = arith.constant dense<0.000000e+00> : vector<8x128xf32>
    %19 = tpu.matmul %17, %18, %cst_14 {dimension_numbers = #tpu.dot_dimension_numbers<[1], [0], [0], [1], [0, 0, 1, 1], [], []>} : vector<8x128xbf16>, vector<128x128xbf16>, vector<8x128xf32> -> vector<8x128xf32>
    %c0_15 = arith.constant 0 : index
    %c0_16 = arith.constant 0 : index
    %20 = vector.load %arg7[%c0_15, %c0_16] : memref<1x128xf32, #tpu.memory_space<vmem>>, vector<1x128xf32>
    %21 = vector.broadcast %20 : vector<1x128xf32> to vector<8x128xf32>
    %22 = arith.addf %19, %21 : vector<8x128xf32>
    %c0_17 = arith.constant 0 : index
    %c0_18 = arith.constant 0 : index
    %23 = vector.load %arg8[%c0_17, %c0_18] : memref<8x128xf32, #tpu.memory_space<vmem>>, vector<8x128xf32>
    tpu.vector_store %arg8[%c0_17, %c0_18], %22 {strides = array<i32>} : memref<8x128xf32, #tpu.memory_space<vmem>>, vector<8x128xf32>,
    return
  }
  func.func @transform_0(%arg0: i32) -> (i32, i32) {
    %c0_i32 = arith.constant 0 : i32
    %c0_i32_0 = arith.constant 0 : i32
    return %arg0, %c0_i32 : i32, i32
  }
  func.func @transform_1(%arg0: i32) -> (i32, i32) {
    %c0_i32 = arith.constant 0 : i32
    %c0_i32_0 = arith.constant 0 : i32
    %c0_i32_1 = arith.constant 0 : i32
    return %c0_i32, %c0_i32_0 : i32, i32
  }
  func.func @transform_2(%arg0: i32) -> (i32, i32) {
    %c0_i32 = arith.constant 0 : i32
    %c0_i32_0 = arith.constant 0 : i32
    %c0_i32_1 = arith.constant 0 : i32
    return %c0_i32, %c0_i32_0 : i32, i32
  }
  func.func @transform_3(%arg0: i32) -> (i32, i32) {
    %c0_i32 = arith.constant 0 : i32
    %c0_i32_0 = arith.constant 0 : i32
    %c0_i32_1 = arith.constant 0 : i32
    return %c0_i32, %c0_i32_0 : i32, i32
  }
  func.func @transform_4(%arg0: i32) -> (i32, i32) {
    %c0_i32 = arith.constant 0 : i32
    %c0_i32_0 = arith.constant 0 : i32
    %c0_i32_1 = arith.constant 0 : i32
    return %c0_i32, %c0_i32_0 : i32, i32
  }
  func.func @transform_5(%arg0: i32) -> (i32, i32) {
    %c0_i32 = arith.constant 0 : i32
    %c0_i32_0 = arith.constant 0 : i32
    %c0_i32_1 = arith.constant 0 : i32
    return %c0_i32, %c0_i32_0 : i32, i32
  }
  func.func @transform_6(%arg0: i32) -> (i32, i32) {
    %c0_i32 = arith.constant 0 : i32
    %c0_i32_0 = arith.constant 0 : i32
    %c0_i32_1 = arith.constant 0 : i32
    return %c0_i32, %c0_i32_0 : i32, i32
  }
  func.func @transform_7(%arg0: i32) -> (i32, i32) {
    %c0_i32 = arith.constant 0 : i32
    %c0_i32_0 = arith.constant 0 : i32
    return %arg0, %c0_i32 : i32, i32
  }
}

</mosaic_0001>

<bundles_post_ra>
// kernel: _lambda_.1
= control target key start
LH: loop header
LB: loop body
LE: loop exit
PB: predicated region body
PF: predicated region fallthrough
CT: control target
= control target key end

     0   :  { %12 = vsyncpa [#allocation3], 0  ;;  %s732_s0 = inlined_call_operand.vmem [shape: f32[8,128], index: 0, kind: input, shape index: {}]   ;;  %s733_s1 = inlined_call_operand.hbm [shape: bf16[128,128], index: 1, kind: input, shape index: {}]   ;;  %s734_s2 = inlined_call_operand.hbm [shape: bf16[128,128], index: 2, kind: input, shape index: {}]   ;;  %s735_s3 = inlined_call_operand.vmem [shape: bf16[128,128], index: 3, kind: input, shape index: {}]   ;;  %s736_s4 = inlined_call_operand.vmem [shape: f32[1,128], index: 4, kind: input, shape index: {}]   ;;  %s737_s5 = inlined_call_operand.vmem [shape: f32[1,128], index: 5, kind: input, shape index: {}]   ;;  %s738_s6 = inlined_call_operand.vmem [shape: f32[1,128], index: 6, kind: input, shape index: {}]   ;;  %s739_s7 = inlined_call_operand.vmem [shape: f32[8,128], index: 7, kind: output, shape index: {}]  }
   0x1   :  { %13 = vsyncpa [#allocation5], 0  ;;  %s593_s24 = smov [#allocation2]   ;;  %s545_s28 = scalar_lea.hbm %s733_s1, 1024 }
   0x2   :  { %s21_s25 = sshll.u32 %s593_s24, 4  ;;  %p546_p0 = scmp.ne.s32.totalorder %s733_s1, %s545_s28  ;;  %s22_s25 = int_to_ptr.vmem [resolvable:$true] %s21_s25 }
   0x3   :  { %p549_p1 = scmp.lt.u32.totalorder %s545_s28, %s733_s1 }
   0x5   :  { %p551_p2 = pnand %p549_p1, %p546_p0 }
   0x7   :  { %554 = shalt.err (!%p551_p2)
}
   0x8   :  { %s555_s10 = scalar_lea.vmem %s22_s25, 1024  ;;  %p560_p4 = scmp.lt.s32.totalorder %s22_s25, %s22_s25 }
   0x9   :  { %p556_p3 = scmp.ne.s32.totalorder %s22_s25, %s555_s10  ;;  %p561_p5 = scmp.lt.s32.totalorder %s555_s10, %s555_s10 }
   0xb   :  { %p562_p6 = por %p561_p5, %p560_p4 }
   0xd   :  { %p563_p7 = pnand %p562_p6, %p556_p3 }
   0xf   :  { %566 = shalt.err (!%p563_p7)
}
  0x10   :  { %s594_s11 = smov 64   ;;  %s595_s12 = smov 4  }
  0x11   :  { %27 = dma.hbm_to_vmem [thread:$0]  %s733_s1, 1024, %s22_s25, [#allocation3], %s594_s11, %s594_s11, %s595_s12  }
  0x12   :  { %s596_s15 = smov [#allocation4]   ;;  %s567_s19 = scalar_lea.hbm %s734_s2, 1024 }
  0x13   :  { %s33_s16 = sshll.u32 %s596_s15, 4  ;;  %p568_p8 = scmp.ne.s32.totalorder %s734_s2, %s567_s19  ;;  %s34_s16 = int_to_ptr.vmem [resolvable:$true] %s33_s16 }
  0x14   :  { %p571_p9 = scmp.lt.u32.totalorder %s567_s19, %s734_s2 }
  0x16   :  { %p573_p10 = pnand %p571_p9, %p568_p8 }
  0x18   :  { %576 = shalt.err (!%p573_p10)
}
  0x19   :  { %s577_s24 = scalar_lea.vmem %s34_s16, 1024  ;;  %p582_p12 = scmp.lt.s32.totalorder %s34_s16, %s34_s16 }
  0x1a   :  { %p578_p11 = scmp.ne.s32.totalorder %s34_s16, %s577_s24  ;;  %p583_p13 = scmp.lt.s32.totalorder %s577_s24, %s577_s24 }
  0x1c   :  { %p584_p0 = por %p583_p13, %p582_p12 }
  0x1e   :  { %p585_p1 = pnand %p584_p0, %p578_p11 }
  0x20   :  { %588 = shalt.err (!%p585_p1)
}
  0x21   :  { %39 = dma.hbm_to_vmem [thread:$0]  %s734_s2, 1024, %s34_s16, [#allocation5], %s594_s11, %s594_s11, %s595_s12  }
  0x22   :  { %589 = dma.done.wait [#allocation3], 1024  }
  0x23   :  { %590 = vsyncadd [#allocation3], 4294966272 }
  0x24   :  { %591 = dma.done.wait [#allocation5], 1024  }
  0x25   :  { %592 = vsyncadd [#allocation5], 4294966272  ;;  %v597_v0 = vmov 0.0   ;;  %vm598_vm0 = vmmov 0   ;;  %v521_v1 = vld [vmem:[#allocation2] sm:$0xff]   ;;  %v522_v2 = vld [vmem:[#allocation2 + $0x8] sm:$0xff]  }
  0x26   :  { %455 = vmatprep.subr.bf16.mxu0 %v597_v0  ;;  %471 = vmatprep.mubr.msk.bf16.mxu0 %vm598_vm0, %v597_v0  ;;  %v523_v3 = vld [vmem:[#allocation2 + $0x10] sm:$0xff]   ;;  %v529_v4 = vld [vmem:[#allocation4] sm:$0xff]   ;;  %v524_v5 = vld [vmem:[#allocation2 + $0x18] sm:$0xff]  }
  0x27   :  { %475 = vmatprep.subr.bf16.mxu1 %v597_v0  ;;  %491 = vmatprep.mubr.msk.bf16.mxu1 %vm598_vm0, %v597_v0  ;;  %v530_v6 = vld [vmem:[#allocation4 + $0x8] sm:$0xff]   ;;  %v525_v7 = vld [vmem:[#allocation2 + $0x20] sm:$0xff]   ;;  %v531_v8 = vld [vmem:[#allocation4 + $0x10] sm:$0xff]  }
  0x28   :  { %456 = vmatpush3.bf16.msra.mxu0 %v521_v1  ;;  %476 = vmatpush3.bf16.msra.mxu1 %v529_v4  ;;  %v526_v9 = vld [vmem:[#allocation2 + $0x28] sm:$0xff]   ;;  %v532_v10 = vld [vmem:[#allocation4 + $0x18] sm:$0xff]   ;;  %v527_v11 = vld [vmem:[#allocation2 + $0x30] sm:$0xff]  }
  0x29   :  { %457 = vmatprep.subr.bf16.mxu0 %v597_v0  ;;  %477 = vmatprep.subr.bf16.mxu1 %v597_v0  ;;  %v533_v12 = vld [vmem:[#allocation4 + $0x20] sm:$0xff]   ;;  %v528_v13 = vld [vmem:[#allocation2 + $0x38] sm:$0xff]   ;;  %v534_v15 = vld [vmem:[#allocation4 + $0x28] sm:$0xff]  }
  0x2a   :  { %v55_v14 = vld [vmem:[%s732_s0] sm:$0xff]  ;;  %v535_v17 = vld [vmem:[#allocation4 + $0x30] sm:$0xff]   ;;  %v536_v18 = vld [vmem:[#allocation4 + $0x38] sm:$0xff]  }
  0x2b   :  { %v56_v16 = vpack.c.bf16 %v55_v14, %v55_v14  ;;  %v537_v19 = vld [vmem:[%s735_s3] sm:$0xff]   ;;  %v538_v20 = vld [vmem:[%s735_s3 + $0x8] sm:$0xff]   ;;  %v539_v21 = vld [vmem:[%s735_s3 + $0x10] sm:$0xff]  }
  0x2c   :  { %458 = vmatpush3.bf16.msra.mxu0 %v522_v2  ;;  %478 = vmatpush3.bf16.msra.mxu1 %v530_v6  ;;  %v540_v22 = vld [vmem:[%s735_s3 + $0x18] sm:$0xff]   ;;  %v541_v23 = vld [vmem:[%s735_s3 + $0x20] sm:$0xff]   ;;  %v542_v24 = vld [vmem:[%s735_s3 + $0x28] sm:$0xff]  }
  0x2d   :  { %459 = vmatprep.subr.bf16.mxu0 %v597_v0  ;;  %479 = vmatprep.subr.bf16.mxu1 %v597_v0  ;;  %v401_v25 = vld [vmem:[%s736_s4] ss:$0 sm:$0xff]  ;;  %v543_v33 = vld [vmem:[%s735_s3 + $0x30] sm:$0xff]   ;;  %v544_v34 = vld [vmem:[%s735_s3 + $0x38] sm:$0xff]  }
  0x2e   :  { %v410_v35 = vld [vmem:[%s737_s5] ss:$0 sm:$0xff] }
  0x2f   :  { %v419_v43 = vld [vmem:[%s738_s6] ss:$0 sm:$0xff] }
  0x30   :  { %460 = vmatpush3.bf16.msra.mxu0 %v523_v3  ;;  %480 = vmatpush3.bf16.msra.mxu1 %v531_v8 }
  0x31   :  { %461 = vmatprep.subr.bf16.mxu0 %v597_v0  ;;  %481 = vmatprep.subr.bf16.mxu1 %v597_v0 }
  0x34   :  { %462 = vmatpush3.bf16.msra.mxu0 %v524_v5  ;;  %482 = vmatpush3.bf16.msra.mxu1 %v532_v10 }
  0x35   :  { %463 = vmatprep.subr.bf16.mxu0 %v597_v0  ;;  %483 = vmatprep.subr.bf16.mxu1 %v597_v0 }
  0x38   :  { %464 = vmatpush3.bf16.msra.mxu0 %v525_v7  ;;  %484 = vmatpush3.bf16.msra.mxu1 %v533_v12 }
  0x39   :  { %465 = vmatprep.subr.bf16.mxu0 %v597_v0  ;;  %485 = vmatprep.subr.bf16.mxu1 %v597_v0 }
  0x3c   :  { %466 = vmatpush3.bf16.msra.mxu0 %v526_v9  ;;  %486 = vmatpush3.bf16.msra.mxu1 %v534_v15 }
  0x3d   :  { %467 = vmatprep.subr.bf16.mxu0 %v597_v0  ;;  %487 = vmatprep.subr.bf16.mxu1 %v597_v0 }
  0x40   :  { %468 = vmatpush3.bf16.msra.mxu0 %v527_v11  ;;  %488 = vmatpush3.bf16.msra.mxu1 %v535_v17 }
  0x41   :  { %469 = vmatprep.subr.bf16.mxu0 %v597_v0  ;;  %489 = vmatprep.subr.bf16.mxu1 %v597_v0 }
  0x44   :  { %470 = vmatpush3.bf16.msra.mxu0 %v528_v13  ;;  %490 = vmatpush3.bf16.msra.mxu1 %v536_v18 }
  0x45   :  { %495 = vmatprep.subr.bf16.mxu0 %v597_v0 }
  0x47   :  { %472 = vmatmul.mubr.bf16.vlgmr.msra.gmra.mrb[0].mxu0 %v56_v16 }
  0x48   :  { %511 = vmatprep.mubr.msk.bf16.mxu0 %vm598_vm0, %v597_v0  ;;  %496 = vmatpush3.bf16.msra.mxu0 %v537_v19 }
  0x49   :  { %497 = vmatprep.subr.bf16.mxu0 %v597_v0 }
  0x4c   :  { %498 = vmatpush3.bf16.msra.mxu0 %v538_v20 }
  0x4d   :  { %499 = vmatprep.subr.bf16.mxu0 %v597_v0 }
  0x50   :  { %500 = vmatpush3.bf16.msra.mxu0 %v539_v21 }
  0x51   :  { %501 = vmatprep.subr.bf16.mxu0 %v597_v0 }
  0x54   :  { %502 = vmatpush3.bf16.msra.mxu0 %v540_v22 }
  0x55   :  { %503 = vmatprep.subr.bf16.mxu0 %v597_v0 }
  0x58   :  { %504 = vmatpush3.bf16.msra.mxu0 %v541_v23 }
  0x59   :  { %505 = vmatprep.subr.bf16.mxu0 %v597_v0 }
  0x5c   :  { %506 = vmatpush3.bf16.msra.mxu0 %v542_v24 }
  0x5d   :  { %507 = vmatprep.subr.bf16.mxu0 %v597_v0 }
  0x60   :  { %508 = vmatpush3.bf16.msra.mxu0 %v543_v33 }
  0x61   :  { %509 = vmatprep.subr.bf16.mxu0 %v597_v0 }
  0x64   :  { %510 = vmatpush3.bf16.msra.mxu0 %v544_v34 }
 0x11a   :  { %v162_v26 = vpop.f32.mrb[0].mxu0 }
 0x11b   :  { %v163_v27 = vadd.f32 %v401_v25, %v162_v26  ;;  %v473_v28 = vpop.f32.mrb[1].mxu0 }
 0x11c   :  { %v165_v29 = vpop.f32.mrb[2].mxu0 }
 0x11d   :  { %v168_v30 = vmax.f32 %v163_v27, 0.0  ;;  %v474_v31 = vpop.f32.mrb[3].mxu0 }
 0x11f   :  { %v169_v32 = vpack.c.bf16 %v168_v30, %v168_v30 }
 0x121   :  { %492 = vmatmul.mubr.bf16.vlgmr.msra.gmra.mrb[0].mxu1 %v169_v32 }
 0x1f4   :  { %v275_v36 = vpop.f32.mrb[0].mxu1 }
 0x1f5   :  { %v276_v37 = vadd.f32 %v410_v35, %v275_v36  ;;  %v493_v38 = vpop.f32.mrb[1].mxu1 }
 0x1f6   :  { %v278_v39 = vpop.f32.mrb[2].mxu1 }
 0x1f7   :  { %v281_v40 = vmax.f32 %v276_v37, 0.0  ;;  %v494_v41 = vpop.f32.mrb[3].mxu1 }
 0x1f9   :  { %v282_v42 = vpack.c.bf16 %v281_v40, %v281_v40 }
 0x1fb   :  { %512 = vmatmul.mubr.bf16.vlgmr.msra.gmra.mrb[4].mxu0 %v282_v42 }
 0x2ce   :  { %v388_v44 = vpop.f32.mrb[4].mxu0 }
 0x2cf   :  { %v389_v45 = vadd.f32 %v419_v43, %v388_v44  ;;  %v513_v46 = vpop.f32.mrb[5].mxu0 }
 0x2d0   :  { %v391_v47 = vpop.f32.mrb[6].mxu0 }
 0x2d1   :  { %394 = vst [vmem:[%s739_s7] sm:$0xff] %v389_v45  ;;  %v514_v48 = vpop.f32.mrb[7].mxu0 }
 0x2d2   :  { %399 = vsyncpa [#allocation3], 1 }
 0x2d3   :  { %400 = vsyncpa [#allocation5], 1 }

</bundles_post_ra>
